<compile_context>
chip_gen: v5e
topology: v5e:2x2
jax: 0.10.0
libtpu: 0.0.40
codegen_flags: <defaults>
</compile_context>

<pallas_src>
import functools
import math

import jax
import jax.numpy as jnp
from jax.experimental import pallas as pl
from jax.experimental.pallas import tpu as pltpu

# 3x3 taps in (ky, kx) row-major order; (dy, dx) = (ky - 1, kx - 1).
TAPS = tuple((ky - 1, kx - 1) for ky in range(3) for kx in range(3))

_INV_SQRT2 = 0.7071067811865476


def _round_up(a, b):
    return (a + b - 1) // b * b


def _erf_approx(x):
    # Abramowitz & Stegun 7.1.26, |error| < 1.5e-7.  Uses only exp / mul /
    # add / select so it lowers on v5e/v6e/v7x (no reliance on a lax.erf
    # Mosaic rule); exp goes to the EUP slot.
    p = 0.3275911
    a1, a2, a3, a4, a5 = (0.254829592, -0.284496736, 1.421413741,
                          -1.453152027, 1.061405429)
    ax = jnp.abs(x)
    t = 1.0 / (1.0 + p * ax)
    poly = ((((a5 * t + a4) * t + a3) * t + a2) * t + a1) * t
    y = 1.0 - poly * jnp.exp(-ax * ax)
    return jnp.where(x >= 0, y, -y)


def _gelu_erf(x):
    # Exact-erf GELU (PyTorch F.gelu default), NOT the tanh approximation.
    return 0.5 * x * (1.0 + _erf_approx(x * _INV_SQRT2))


def _mlp_kernel(x_ref, wf_ref, wo_ref, o_ref, *, w_pad, hid):
    # x_ref : (1, 1, Cp, P)      one row-tile (1-row halo + W zero-pad), bf16
    # wf_ref: (2*hid, 9*Cp)      fused per-tap weights (dwconv o project_in), bf16
    # wo_ref: (C, hid)           project_out weights, bf16
    # o_ref : (1, 1, C, P)       output tile (f32, lane-dense P % 128 == 0)
    x = x_ref[0, 0].astype(jnp.float32)                     # (Cp, P)
    p_len = x.shape[-1]

    # 9 shifted copies via XLU lane rolls; wrap contamination lands only in
    # padding rows/cols that the wrapper throws away (no masks needed).
    pieces = []
    for (dy, dx) in TAPS:
        d = dy * w_pad + dx
        pieces.append(x if d == 0 else pltpu.roll(x, (-d) % p_len, axis=1))
    xs = jnp.concatenate(pieces, axis=0).astype(jnp.bfloat16)   # (9*Cp, P)

    # Single fused MXU matmul: project_in + grouped 3x3 dwconv, K = 9*Cp.
    acc = jnp.dot(wf_ref[...], xs,
                  preferred_element_type=jnp.float32)           # (2*hid, P) f32

    x1 = acc[:hid]                                              # chunk(2, dim=1)
    x2 = acc[hid:]
    z = (_gelu_erf(x1) * x2).astype(jnp.bfloat16)               # gate in f32, cast for MXU

    out = jnp.dot(wo_ref[...], z,
                  preferred_element_type=jnp.float32)           # (C, P)
    o_ref[0, 0] = out.astype(o_ref.dtype)


def _choose_tile_rows(H, W, C, hid):
    """Largest row-tile (divisor of H, <= H//2 so >=2 spatial tiles when
    possible) whose in-kernel intermediates stay within a modest VMEM budget
    (sized for v7x's 64 MiB / 32 MiB-scoped VMEM)."""
    Wp = W + 2
    Cp = _round_up(C, 8)
    budget = 8 * 1024 * 1024
    cap = max(H // 2, 1)
    best = 1
    for tr in range(1, H + 1):
        if H % tr or tr > cap:
            continue
        tile_p = _round_up((tr + 2) * Wp, 128)
        interm = tile_p * (9 * Cp * 6 + 2 * hid * 4 + hid * 2 + (C + Cp) * 4)
        if interm <= budget:
            best = tr
    return best


def mlp_pallas(x, w_in, w_dw, w_out):
    """Forward pass of the PyTorch Mlp module (bias=False).

    x    : (N, C, H, W) float32
    w_in : (2*hid, C, 1, 1)   project_in.weight   (hid = ffn_expansion_factor * C)
    w_dw : (2*hid, 2, 3, 3)   dwconv.weight       (groups = hid)
    w_out: (C, hid, 1, 1)     project_out.weight
    """
    N, C, H, W = x.shape
    hid2 = w_in.shape[0]
    hid = hid2 // 2
    Wp = W + 2
    Cp = _round_up(C, 8)

    tr = _choose_tile_rows(H, W, C, hid)
    nt = H // tr
    rows = tr + 2                                   # tile rows incl. 1-row halo
    P_rows = rows * Wp
    P_tile = _round_up(P_rows, 128)                 # lane-dense store width

    # --- fold the grouped 3x3 dwconv into project_in (plain JAX, tiny) ------
    w_in2 = w_in[:, :, 0, 0].astype(jnp.float32)            # (2*hid, C)
    g = (jnp.arange(hid2) // 2) * 2
    win_a = w_in2[g]                                        # group input slot 0
    win_b = w_in2[g + 1]                                    # group input slot 1
    m_taps = jnp.stack(
        [w_dw[:, 0, dy + 1, dx + 1].astype(jnp.float32)[:, None] * win_a
         + w_dw[:, 1, dy + 1, dx + 1].astype(jnp.float32)[:, None] * win_b
         for (dy, dx) in TAPS], axis=0)                     # (9, 2*hid, C)
    m_taps = jnp.pad(m_taps, ((0, 0), (0, 0), (0, Cp - C)))  # channel pad -> aligned
    w_fused = m_taps.transpose(1, 0, 2).reshape(hid2, 9 * Cp).astype(jnp.bfloat16)
    w_out2 = w_out[:, :, 0, 0].astype(jnp.bfloat16)         # (C, hid)

    # --- zero-pad H/W by 1, pad channels to Cp, cut overlapping halo'd row
    #     tiles, flatten spatially, pad lanes to a multiple of 128, ship bf16.
    x_pad = jnp.pad(x, ((0, 0), (0, Cp - C), (1, 1), (1, 1)))     # (N, Cp, H+2, Wp)
    x_tiles = jnp.stack(
        [x_pad[:, :, j * tr: j * tr + rows, :] for j in range(nt)],
        axis=1)                                                   # (N, nt, Cp, rows, Wp)
    x_tiles = x_tiles.reshape(N, nt, Cp, P_rows)
    if P_tile != P_rows:
        x_tiles = jnp.pad(x_tiles, ((0, 0), (0, 0), (0, 0), (0, P_tile - P_rows)))
    x_tiles = x_tiles.astype(jnp.bfloat16)

    kernel = functools.partial(_mlp_kernel, w_pad=Wp, hid=hid)

    # Advisory cost + explicit VMEM budget sized to the tiled buffers.
    flops = 2 * N * nt * P_tile * (hid2 * 9 * Cp + C * hid)
    bytes_accessed = (N * nt * Cp * P_tile * 2 + N * nt * C * P_tile * 4
                      + hid2 * 9 * Cp * 2 + C * hid * 2)
    cost = pl.CostEstimate(flops=flops,
                           transcendentals=N * nt * hid * P_tile,
                           bytes_accessed=bytes_accessed)
    vmem_limit = int(
        2 * (Cp * P_tile * 2 + C * P_tile * 4)          # double-buffered in/out tiles
        + 2 * (hid2 * 9 * Cp * 2 + C * hid * 2)         # (double-buffered) constants
        + P_tile * (9 * Cp * 6 + hid2 * 4 + hid * 2 + C * 4)   # in-kernel intermediates
        + (2 << 20))
    vmem_limit = min(max(vmem_limit, 8 << 20), 64 << 20)

    out_tiles = pl.pallas_call(
        kernel,
        out_shape=jax.ShapeDtypeStruct((N, nt, C, P_tile), jnp.float32),
        grid_spec=pltpu.PrefetchScalarGridSpec(
            num_scalar_prefetch=0,
            grid=(N, nt),
            in_specs=[
                pl.BlockSpec((1, 1, Cp, P_tile), lambda n, j: (n, j, 0, 0)),
                pl.BlockSpec((hid2, 9 * Cp), lambda n, j: (0, 0)),
                pl.BlockSpec((C, hid), lambda n, j: (0, 0)),
            ],
            out_specs=pl.BlockSpec((1, 1, C, P_tile), lambda n, j: (n, j, 0, 0)),
        ),
        compiler_params=pltpu.CompilerParams(
            dimension_semantics=("parallel", "parallel"),
            vmem_limit_bytes=vmem_limit),
        cost_estimate=cost,
    )(x_tiles, w_fused, w_out2)

    # --- drop lane padding, halo rows and the W zero-padding columns --------
    out = out_tiles[..., :P_rows].reshape(N, nt, C, rows, Wp)
    out = out[:, :, :, 1:tr + 1, 1:W + 1]                    # (N, nt, C, tr, W)
    return out.transpose(0, 2, 1, 3, 4).reshape(N, C, H, W).astype(x.dtype)


def mlp_reference(x, w_in, w_dw, w_out):
    """Pure-JAX reference mirroring the PyTorch module (exact-erf GELU)."""
    hid = w_out.shape[1]
    y = jax.lax.conv_general_dilated(
        x, w_in, (1, 1), "VALID",
        dimension_numbers=("NCHW", "OIHW", "NCHW"))
    y = jax.lax.conv_general_dilated(
        y, w_dw, (1, 1), ((1, 1), (1, 1)),
        dimension_numbers=("NCHW", "OIHW", "NCHW"),
        feature_group_count=hid)
    x1, x2 = y[:, :hid], y[:, hid:]
    z = jax.nn.gelu(x1, approximate=False) * x2
    return jax.lax.conv_general_dilated(
        z, w_out, (1, 1), "VALID",
        dimension_numbers=("NCHW", "OIHW", "NCHW"))


if __name__ == "__main__":
    N, C, H, W = 2, 4, 16, 16
    ffn_expansion_factor = 2
    hid = C * ffn_expansion_factor                          # hidden_features = 8

    key = jax.random.PRNGKey(0)
    kx, k1, k2, k3 = jax.random.split(key, 4)
    x = jax.random.normal(kx, (N, C, H, W), jnp.float32)

    def conv_init(k, shape):
        # nn.Conv2d default init: U(-1/sqrt(fan_in), 1/sqrt(fan_in))
        fan_in = shape[1] * shape[2] * shape[3]
        bound = 1.0 / math.sqrt(fan_in)
        return jax.random.uniform(k, shape, jnp.float32, minval=-bound, maxval=bound)

    w_in = conv_init(k1, (2 * hid, C, 1, 1))                # project_in.weight
    w_dw = conv_init(k2, (2 * hid, 2, 3, 3))                # dwconv.weight (groups=hid)
    w_out = conv_init(k3, (C, hid, 1, 1))                   # project_out.weight

    out = jax.block_until_ready(mlp_pallas(x, w_in, w_dw, w_out))
    ref = jax.block_until_ready(mlp_reference(x, w_in, w_dw, w_out))

    assert out.shape == ref.shape and out.dtype == ref.dtype
    max_err = jnp.max(jnp.abs(out - ref))
    assert jnp.allclose(out, ref, atol=1e-2, rtol=1e-2), f"max abs err = {max_err}"
    print("KERNEL_OK")
</pallas_src>

<mosaic_0001>
module attributes {stable_mosaic.version = 11 : i64} {
  func.func @_mlp_kernel(%arg0: i32, %arg1: i32, %arg2: memref<1x1x8x256xbf16, #tpu.memory_space<vmem>>, %arg3: memref<16x72xbf16, #tpu.memory_space<vmem>>, %arg4: memref<4x8xbf16, #tpu.memory_space<vmem>>, %arg5: memref<1x1x4x256xf32, #tpu.memory_space<vmem>>) attributes {dimension_semantics = [#tpu.dimension_semantics<parallel>, #tpu.dimension_semantics<parallel>], iteration_bounds = array<i64: 2, 2>, scalar_prefetch = 0 : i64, scratch_operands = 0 : i64, tpu.core_type = #tpu.core_type<tc>, window_params = [{transform_indices = @transform_0, window_bounds = array<i64: 1, 1, 8, 256>}, {pipeline_mode = #tpu.pipeline_mode<synchronous>, transform_indices = @transform_1, window_bounds = array<i64: 16, 72>}, {pipeline_mode = #tpu.pipeline_mode<synchronous>, transform_indices = @transform_2, window_bounds = array<i64: 4, 8>}, {transform_indices = @transform_3, window_bounds = array<i64: 1, 1, 4, 256>}]} {
    %c0 = arith.constant 0 : index
    %c0_0 = arith.constant 0 : index
    %c0_1 = arith.constant 0 : index
    %c0_2 = arith.constant 0 : index
    %0 = vector.load %arg2[%c0, %c0_0, %c0_1, %c0_2] : memref<1x1x8x256xbf16, #tpu.memory_space<vmem>>, vector<1x1x8x256xbf16>
    %1 = vector.shape_cast %0 : vector<1x1x8x256xbf16> to vector<8x256xbf16>
    %2 = arith.extf %1 : vector<8x256xbf16> to vector<8x256xf32>
    %c19_i32 = arith.constant 19 : i32
    %3 = tpu.dynamic_rotate %2 by %c19_i32 dim 1 : vector<8x256xf32>, i32 -> vector<8x256xf32>
    %c18_i32 = arith.constant 18 : i32
    %4 = tpu.dynamic_rotate %2 by %c18_i32 dim 1 : vector<8x256xf32>, i32 -> vector<8x256xf32>
    %c17_i32 = arith.constant 17 : i32
    %5 = tpu.dynamic_rotate %2 by %c17_i32 dim 1 : vector<8x256xf32>, i32 -> vector<8x256xf32>
    %c1_i32 = arith.constant 1 : i32
    %6 = tpu.dynamic_rotate %2 by %c1_i32 dim 1 : vector<8x256xf32>, i32 -> vector<8x256xf32>
    %c255_i32 = arith.constant 255 : i32
    %7 = tpu.dynamic_rotate %2 by %c255_i32 dim 1 : vector<8x256xf32>, i32 -> vector<8x256xf32>
    %c239_i32 = arith.constant 239 : i32
    %8 = tpu.dynamic_rotate %2 by %c239_i32 dim 1 : vector<8x256xf32>, i32 -> vector<8x256xf32>
    %c238_i32 = arith.constant 238 : i32
    %9 = tpu.dynamic_rotate %2 by %c238_i32 dim 1 : vector<8x256xf32>, i32 -> vector<8x256xf32>
    %c237_i32 = arith.constant 237 : i32
    %10 = tpu.dynamic_rotate %2 by %c237_i32 dim 1 : vector<8x256xf32>, i32 -> vector<8x256xf32>
    %11 = tpu.concatenate %3, %4, %5, %6, %2, %7, %8, %9, %10 in 0 : vector<8x256xf32>, vector<8x256xf32>, vector<8x256xf32>, vector<8x256xf32>, vector<8x256xf32>, vector<8x256xf32>, vector<8x256xf32>, vector<8x256xf32>, vector<8x256xf32> -> vector<72x256xf32>
    %12 = arith.truncf %11 : vector<72x256xf32> to vector<72x256xbf16>
    %c0_3 = arith.constant 0 : index
    %c0_4 = arith.constant 0 : index
    %13 = vector.load %arg3[%c0_3, %c0_4] : memref<16x72xbf16, #tpu.memory_space<vmem>>, vector<16x72xbf16>
    %cst = arith.constant dense<0.000000e+00> : vector<16x256xf32>
    %14 = tpu.matmul %13, %12, %cst {dimension_numbers = #tpu.dot_dimension_numbers<[1], [0], [0], [1], [0, 0, 1, 1], [], []>} : vector<16x72xbf16>, vector<72x256xbf16>, vector<16x256xf32> -> vector<16x256xf32>
    %15 = vector.extract_strided_slice %14 {offsets = [0, 0], sizes = [8, 256], strides = [1, 1]} : vector<16x256xf32> to vector<8x256xf32>
    %16 = vector.extract_strided_slice %14 {offsets = [8, 0], sizes = [8, 256], strides = [1, 1]} : vector<16x256xf32> to vector<8x256xf32>
    %cst_5 = arith.constant 5.000000e-01 : f32
    %17 = vector.broadcast %cst_5 : f32 to vector<8x256xf32>
    %18 = arith.mulf %17, %15 : vector<8x256xf32>
    %cst_6 = arith.constant 0.707106769 : f32
    %19 = vector.broadcast %cst_6 : f32 to vector<8x256xf32>
    %20 = arith.mulf %15, %19 : vector<8x256xf32>
    %21 = math.absf %20 : vector<8x256xf32>
    %cst_7 = arith.constant 0.327591091 : f32
    %22 = vector.broadcast %cst_7 : f32 to vector<8x256xf32>
    %23 = arith.mulf %22, %21 : vector<8x256xf32>
    %cst_8 = arith.constant 1.000000e+00 : f32
    %24 = vector.broadcast %cst_8 : f32 to vector<8x256xf32>
    %25 = arith.addf %24, %23 : vector<8x256xf32>
    %cst_9 = arith.constant 1.000000e+00 : f32
    %26 = vector.broadcast %cst_9 : f32 to vector<8x256xf32>
    %27 = arith.divf %26, %25 : vector<8x256xf32>
    %cst_10 = arith.constant 1.06140542 : f32
    %28 = vector.broadcast %cst_10 : f32 to vector<8x256xf32>
    %29 = arith.mulf %28, %27 : vector<8x256xf32>
    %cst_11 = arith.constant -1.45315206 : f32
    %30 = vector.broadcast %cst_11 : f32 to vector<8x256xf32>
    %31 = arith.addf %29, %30 : vector<8x256xf32>
    %32 = arith.mulf %31, %27 : vector<8x256xf32>
    %cst_12 = arith.constant 1.42141378 : f32
    %33 = vector.broadcast %cst_12 : f32 to vector<8x256xf32>
    %34 = arith.addf %32, %33 : vector<8x256xf32>
    %35 = arith.mulf %34, %27 : vector<8x256xf32>
    %cst_13 = arith.constant -0.284496725 : f32
    %36 = vector.broadcast %cst_13 : f32 to vector<8x256xf32>
    %37 = arith.addf %35, %36 : vector<8x256xf32>
    %38 = arith.mulf %37, %27 : vector<8x256xf32>
    %cst_14 = arith.constant 0.254829586 : f32
    %39 = vector.broadcast %cst_14 : f32 to vector<8x256xf32>
    %40 = arith.addf %38, %39 : vector<8x256xf32>
    %41 = arith.mulf %40, %27 : vector<8x256xf32>
    %cst_15 = arith.constant 0.000000e+00 : f32
    %42 = vector.broadcast %cst_15 : f32 to vector<8x256xf32>
    %43 = arith.subf %42, %21 : vector<8x256xf32>
    %44 = arith.mulf %43, %21 : vector<8x256xf32>
    %45 = math.exp %44 : vector<8x256xf32>
    %46 = arith.mulf %41, %45 : vector<8x256xf32>
    %cst_16 = arith.constant 1.000000e+00 : f32
    %47 = vector.broadcast %cst_16 : f32 to vector<8x256xf32>
    %48 = arith.subf %47, %46 : vector<8x256xf32>
    %cst_17 = arith.constant 0.000000e+00 : f32
    %49 = vector.broadcast %cst_17 : f32 to vector<8x256xf32>
    %50 = arith.cmpf oge, %20, %49 : vector<8x256xf32>
    %cst_18 = arith.constant 0.000000e+00 : f32
    %51 = vector.broadcast %cst_18 : f32 to vector<8x256xf32>
    %52 = arith.subf %51, %48 : vector<8x256xf32>
    %53 = arith.select %50, %48, %52 : vector<8x256xi1>, vector<8x256xf32>
    %cst_19 = arith.constant 1.000000e+00 : f32
    %54 = vector.broadcast %cst_19 : f32 to vector<8x256xf32>
    %55 = arith.addf %54, %53 : vector<8x256xf32>
    %56 = arith.mulf %18, %55 : vector<8x256xf32>
    %57 = arith.mulf %56, %16 : vector<8x256xf32>
    %58 = arith.truncf %57 : vector<8x256xf32> to vector<8x256xbf16>
    %c0_20 = arith.constant 0 : index
    %c0_21 = arith.constant 0 : index
    %59 = vector.load %arg4[%c0_20, %c0_21] : memref<4x8xbf16, #tpu.memory_space<vmem>>, vector<4x8xbf16>
    %cst_22 = arith.constant dense<0.000000e+00> : vector<4x256xf32>
    %60 = tpu.matmul %59, %58, %cst_22 {dimension_numbers = #tpu.dot_dimension_numbers<[1], [0], [0], [1], [0, 0, 1, 1], [], []>} : vector<4x8xbf16>, vector<8x256xbf16>, vector<4x256xf32> -> vector<4x256xf32>
    %c0_23 = arith.constant 0 : index
    %c0_24 = arith.constant 0 : index
    %c0_25 = arith.constant 0 : index
    %c0_26 = arith.constant 0 : index
    %61 = vector.load %arg5[%c0_23, %c0_24, %c0_25, %c0_26] : memref<1x1x4x256xf32, #tpu.memory_space<vmem>>, vector<1x1x4x256xf32>
    %62 = vector.shape_cast %61 : vector<1x1x4x256xf32> to vector<4x256xf32>
    %63 = vector.shape_cast %60 : vector<4x256xf32> to vector<1x1x4x256xf32>
    tpu.vector_store %arg5[%c0_23, %c0_24, %c0_25, %c0_26], %63 {strides = array<i32>} : memref<1x1x4x256xf32, #tpu.memory_space<vmem>>, vector<1x1x4x256xf32>,
    return
  }
  func.func @transform_0(%arg0: i32, %arg1: i32) -> (i32, i32, i32, i32) {
    %c0_i32 = arith.constant 0 : i32
    %c0_i32_0 = arith.constant 0 : i32
    %c0_i32_1 = arith.constant 0 : i32
    return %arg0, %arg1, %c0_i32, %c0_i32_0 : i32, i32, i32, i32
  }
  func.func @transform_1(%arg0: i32, %arg1: i32) -> (i32, i32) {
    %c0_i32 = arith.constant 0 : i32
    %c0_i32_0 = arith.constant 0 : i32
    %c0_i32_1 = arith.constant 0 : i32
    return %c0_i32, %c0_i32_0 : i32, i32
  }
  func.func @transform_2(%arg0: i32, %arg1: i32) -> (i32, i32) {
    %c0_i32 = arith.constant 0 : i32
    %c0_i32_0 = arith.constant 0 : i32
    %c0_i32_1 = arith.constant 0 : i32
    return %c0_i32, %c0_i32_0 : i32, i32
  }
  func.func @transform_3(%arg0: i32, %arg1: i32) -> (i32, i32, i32, i32) {
    %c0_i32 = arith.constant 0 : i32
    %c0_i32_0 = arith.constant 0 : i32
    %c0_i32_1 = arith.constant 0 : i32
    return %arg0, %arg1, %c0_i32, %c0_i32_0 : i32, i32, i32, i32
  }
}

</mosaic_0001>

<bundles_post_ra>
// kernel: tpu_custom_call.1
= control target key start
LH: loop header
LB: loop body
LE: loop exit
PB: predicated region body
PF: predicated region fallthrough
CT: control target
= control target key end

     0   :  { %s1242_s0 = inlined_call_operand.hbm [shape: bf16[2,2,8,256], index: 0, kind: input, shape index: {}]   ;;  %s1243_s1 = inlined_call_operand.hbm [shape: bf16[16,72], index: 1, kind: input, shape index: {}]   ;;  %s1244_s2 = inlined_call_operand.hbm [shape: bf16[4,8], index: 2, kind: input, shape index: {}]   ;;  %s1245_s3 = inlined_call_operand.hbm [shape: f32[2,2,4,256], index: 3, kind: output, shape index: {}]  }
   0x1   :  { %1248 = sst [smem:[#allocation14_spill]] %s1243_s1 }
   0x2   :  { %1249 = sst [smem:[#allocation15_spill]] %s1244_s2 }
   0x3   :  { %8 = vsyncpa [#allocation3], 0 }
   0x4   :  { %10 = vsyncpa [#allocation3 + $0x1], 0 }
   0x5   :  { %11 = vsyncpa [#allocation6], 0 }
   0x6   :  { %12 = vsyncpa [#allocation4], 0 }
   0x7   :  { %14 = vsyncpa [#allocation4 + $0x1], 0  ;;  %s1021_s12 = smov 0   ;;  %s1023_s13 = smov 0  }
   0x8   :  { %s1025_s14 = smov 0   ;;  %s1027_s15 = smov 0  }
   0x9   :  { %s1029_s16 = smov 0   ;;  %s1031_s17 = smov 0  }
   0xa   :  { %s1033_s18 = smov 0   ;;  %s1035_s19 = smov 0  }
   0xb LB: > { %s608_s20 = sadd.s32 4294967295, %s987_s19   ;;  %p610_p0 = scmp.ge.s32.totalorder %s987_s19, 1  ;;  %s987_s19 = sphi %s1035_s19, %s20_s19   ;;  %s983_s18 = sphi %s1033_s18, %s1268_s18   ;;  %s979_s17 = sphi %s1031_s17, %s1267_s17   ;;  %s975_s16 = sphi %s1029_s16, %s1266_s16   ;;  %s971_s15 = sphi %s1027_s15, %s1265_s15   ;;  %s967_s14 = sphi %s1025_s14, %s1264_s14   ;;  %s963_s13 = sphi %s1023_s13, %s1263_s13   ;;  %s959_s12 = sphi %s1021_s12, %s1262_s12  }
   0xc   : > { %p1065_p1 = scmp.eq.s32.totalorder %s608_s20, 0  ;;  %p135_p2 = scmp.lt.s32.totalorder %s987_s19, 5 }
   0xd   : > { %s1251_s1 = sld [smem:[#allocation14_spill]]  ;;  %s989_s26 = smov [#allocation5]  }
   0xe   : > { %p1073_p3 = pnand %p610_p0, %p135_p2  ;;  %s148_s27 = sshll.u32 %s989_s26, 4  ;;  %s149_s27 = int_to_ptr.vmem [resolvable:$true] %s148_s27 }
   0xf   : > { %s1253_s2 = sld [smem:[#allocation15_spill]]  ;;  %s990_s4 = smov 64  }
  0x10   : > { %p650_p4 = pneg %p1073_p3  ;;  %s991_s5 = smov 4  }
  0x11   : > { %s992_s6 = smov [#allocation7]   ;;  %s609_s8 = sadd.s32 4294967294, %s987_s19  }
  0x12   : > { %p651_p5 = pnand %p650_p4, %p1065_p1  ;;  %s163_s7 = sshll.u32 %s992_s6, 4  ;;  %s164_s7 = int_to_ptr.vmem [resolvable:$true] %s163_s7 }
  0x13   : > { %s146_s24 = sshll.u32 %s1251_s1, 4  ;;  %s29_s9 = sadd.s32 1, %s979_s17  ;;  %s147_s24 = int_to_ptr.hbm [resolvable:$true] %s146_s24 }
  0x14   : > { %653 = dma.hbm_to_vmem [thread:$0]  (!%p651_p5), %s147_s24, 128, %s149_s27, [#allocation6], %s990_s4, %s990_s4, %s991_s5  }
  0x15   : > { %s161_s30 = sshll.u32 %s1253_s2, 4  ;;  %p30_p6 = scmp.ge.s32.totalorder %s29_s9, 2  ;;  %s162_s30 = int_to_ptr.hbm [resolvable:$true] %s161_s30 }
  0x16   : > { %656 = dma.hbm_to_vmem [thread:$0]  (!%p651_p5), %s162_s30, 32, %s164_s7, [#allocation6]  }
  0x17   : > { %s32_s10 = sadd.s32 1, %s983_s18  ;;  %s41_s11 = sadd.s32 1, %s967_s14 }
  0x18   : > { %p48_p7 = scmp.ne.s32.totalorder %s967_s14, %s963_s13  ;;  %s1270_s9 = smov (%p30_p6, %s29_s9), 0 }
  0x19   : > { %1254 = sst [smem:[#allocation12_spill]] %s1270_s9  ;;  %s1272_s10 = smov (!%p30_p6, %s32_s10), %s983_s18 }
  0x1a   : > { %s37_s22 = ssub.s32 %s979_s17, %s1270_s9  ;;  %p49_p8 = scmp.eq.s32.totalorder %s987_s19, 0 }
  0x1b   : > { %p34_p9 = scmp.ge.s32.totalorder %s1272_s10, 2  ;;  %p54_p10 = scmp.ne.s32.totalorder %s963_s13, %s959_s12 }
  0x1c   : > { %p1098_p11 = por %p49_p8, %p48_p7  ;;  %p122_p12 = scmp.eq.s32.totalorder %s608_s20, 3 }
  0x1d   : > { %s1274_s10 = smov (%p34_p9, %s1272_s10), 0  ;;  %p1108_p13 = por %p1065_p1, %p54_p10 }
  0x1e   : > { %1256 = sst [smem:[#allocation13_spill]] %s1274_s10  ;;  %p1112_p0 = por %p122_p12, %p48_p7 }
  0x1f   : > { %s36_s27 = ssub.s32 %s983_s18, %s1274_s10  ;;  %p128_p2 = scmp.eq.s32.totalorder %s609_s8, 3 }
  0x20   : > { %s38_s28 = sor.u32 %s37_s22, %s36_s27  ;;  %p667_p4 = scmp.lt.s32.totalorder %s987_s19, 4 }
  0x21   : > { %p39_p5 = scmp.eq.s32.totalorder %s38_s28, 0  ;;  %p1119_p6 = por %p128_p2, %p54_p10 }
  0x22   : > { %s174_s29 = sand.u32 1, %s967_s14   ;;  %s615_s30 = sshll.u32 %s979_s17, 1 }
  0x23   : > { %s1126_s4 = scalar_select %p39_p5, %s967_s14, %s41_s11  }
  0x24   : > { %s614_s5 = sshll.u32 %s174_s29, 3  ;;  %s616_s6 = sshll.u32 %s983_s18, 2 }
  0x25   : > { %s183_s7 = sadd.s32 %s616_s6, %s615_s30  ;;  %s178_s1 = scalar_lea.vmem [#allocation2], %s614_s5 }
  0x26   : > { %s189_s2 = sshll.u32 %s178_s1, 4  ;;  %s617_s10 = sshll.u32 %s183_s7, 2  ;;  %s190_s2 = int_to_ptr.vmem [resolvable:$true] %s189_s2 }
  0x27   : > { %s185_s22 = scalar_lea.hbm %s1242_s0, %s617_s10  ;;  %p658_p7 = pnand %p667_p4, %p1098_p11 }
  0x28   : > { %s187_s27 = sshll.u32 %s185_s22, 4  ;;  %s175_s28 = scalar_lea.sflag [#allocation3], %s174_s29  ;;  %s188_s27 = int_to_ptr.hbm [resolvable:$true] %s187_s27 }
  0x29   : > { %660 = dma.hbm_to_vmem [thread:$0]  (!%p658_p7), %s188_s27, 128, %s190_s2, %s175_s28  }
  0x2a   : > { %198 = sbr.rel (%p1073_p3) target bundleno = 527 (0x20f), region = 32  ;;  %s1139_s11 = sand.u32 (!%p1073_p3), 1, %s963_s13  }
  0x2b   : > { %s619_s1 = sshll.u32 (!%p1073_p3), %s1139_s11, 3  ;;  %s201_s9 = scalar_lea.sflag (!%p1073_p3), [#allocation3], %s1139_s11 }
  0x2c   : > { %s204_s10 = scalar_lea.vmem (!%p1073_p3), [#allocation2], %s619_s1 }
  0x2f   : > { %946 = dma.done.wait (%p1108_p13), %s201_s9, 128  }
  0x30   : > { %948 = vsyncadd (%p1108_p13), %s201_s9, 4294967168 }
  0x31   : > { %950 = dma.done.wait (%p1065_p1), [#allocation6], 160  }
  0x32   : > { %952 = vsyncadd (%p1065_p1), [#allocation6], 4294967136  ;;  %v1153_v0 = vld [vmem:[%s204_s10] sm:$0xff]  ;;  %s993_s2 = smov 109   ;;  %s994_s25 = smov 110   ;;  %v246_v4 = vlaneseq  ;;  %vm321_vm1 = vcmask 1043456  }
  0x33   : > { %v240_v1 = vunpack.c.l.bf16 %v1153_v0  ;;  %v241_v2 = vunpack.c.h.bf16 %v1153_v0  ;;  %s995_s23 = smov 17   ;;  %s996_s24 = smov 111   ;;  %v637_v58 = vld [vmem:[#allocation5] sm:$0xff]  ;;  %vm317_vm9 = vcmask 588800  }
  0x34   : > { %s997_s21 = smov 127   ;;  %s998_s29 = smov 1   ;;  %v1161_v5 = vand.u32 127, %v246_v4 }
  0x35   : > { %v747_v3 = vpack.i.bf16 %v241_v2, %v240_v1  ;;  %s999_s30 = smov 18   ;;  %s1000_s5 = smov 19  }
  0x36   : > { %vm297_vm0 = vcmp.lt.s32.totalorder %v1161_v5, 109  ;;  %vm290_vm2 = vcmp.lt.s32.totalorder %v1161_v5, 110  ;;  %vm283_vm3 = vcmp.lt.s32.totalorder %v1161_v5, 111  ;;  %vm276_vm4 = vcmp.lt.s32.totalorder %v1161_v5, 127  ;;  %s632_s6 = sshll.u32 %s971_s15, 1  ;;  %s633_s7 = sshll.u32 %s975_s16, 2 }
  0x37   : > { %748 = vrot.lane.b32.xlu0 %v747_v3, %s993_s2  ;;  %758 = vrot.lane.b32.xlu1 %v747_v3, %s994_s25  ;;  %vm262_vm5 = vcmp.lt.s32.totalorder %v1161_v5, 17  ;;  %vm269_vm6 = vcmp.lt.s32.totalorder %v1161_v5, 1  ;;  %vm248_vm7 = vcmp.lt.s32.totalorder %v1161_v5, 19  ;;  %vm255_vm8 = vcmp.lt.s32.totalorder %v1161_v5, 18  ;;  %s495_s8 = sadd.s32 %s633_s7, %s632_s6  ;;  %s237_s10 = scalar_lea.vmem [#allocation8], %s619_s1 }
  0x38   : > { %768 = vrot.lane.b32.xlu2 %v747_v3, %s995_s23  ;;  %s634_s22 = sshll.u32 %s495_s8, 2  ;;  %s499_s2 = sshll.u32 %s237_s10, 4  ;;  %s500_s2 = int_to_ptr.vmem [resolvable:$true] %s499_s2 }
  0x39   : > { %s497_s9 = scalar_lea.hbm %s1245_s3, %s634_s22  ;;  %s484_s15 = scalar_lea.sflag [#allocation4], %s1139_s11 }
  0x3a   : > { %s501_s25 = sshll.u32 %s497_s9, 4  ;;  %s905_s1 = scalar_lea.hbm %s1245_s3, 32  ;;  %s502_s25 = int_to_ptr.hbm [resolvable:$true] %s501_s25 }
  0x3b   : > { %s899_s16 = sshra.s32 %s502_s25, 4  ;;  %s900_s16 = int_to_ptr.hbm [resolvable:$true] %s899_s16 }
  0x3c   : > { %s901_s23 = scalar_lea.hbm %s900_s16, 8  ;;  %p906_p9 = scmp.lt.s32.totalorder %s900_s16, %s1245_s3 }
  0x3d   : > { %p902_p1 = scmp.ne.s32.totalorder %s900_s16, %s901_s23  ;;  %p907_p10 = scmp.lt.s32.totalorder %s905_s1, %s901_s23 }
  0x3f   : > { %753 = vrot.lane.b32.xlu0 %v747_v3, %s996_s24  ;;  %763 = vrot.lane.b32.xlu1 %v747_v3, %s997_s21  ;;  %p903_p3 = pnand %p902_p1, %p1112_p0  ;;  %p908_p11 = por %p907_p10, %p906_p9 }
  0x40   : > { %773 = vrot.lane.b32.xlu2 %v747_v3, %s998_s29 }
  0x41   : > { %p904_p8 = pneg %p903_p3 }
  0x43   : > { %p909_p12 = pnand %p908_p11, %p904_p8 }
  0x47   : > { %783 = vrot.lane.b32.xlu1 %v747_v3, %s999_s30  ;;  %778 = vrot.lane.b32.xlu0 %v747_v3, %s1000_s5 }
  0x92   : > { %v769_v6 = vpop.permute.xlu2 %768 }
  0x93   : > { %v771_v19 = vunpack.i.h.bf16 %v769_v6  ;;  %v770_v27 = vunpack.i.l.bf16 %v769_v6 }
  0x95   : > { %v264_v40 = vsel %vm262_vm5, %v771_v19, %v770_v27  ;;  %v263_v41 = vsel %vm262_vm5, %v770_v27, %v771_v19  ;;  %vm441_vm5 = vcmask 64512  }
  0x9a   : > { %v774_v22 = vpop.permute.xlu2 %773 }
  0x9b   : > { %v776_v34 = vunpack.i.h.bf16 %v774_v22  ;;  %v775_v35 = vunpack.i.l.bf16 %v774_v22 }
  0x9d   : > { %v271_v44 = vsel %vm269_vm6, %v776_v34, %v775_v35  ;;  %v270_v45 = vsel %vm269_vm6, %v775_v35, %v776_v34 }
  0x9e   : > { %v302_v54 = vpack.c.bf16 %v271_v44, %v264_v40  ;;  %v303_v55 = vpack.c.bf16 %v270_v45, %v263_v41 }
  0xa9   : > { %v749_v7 = vpop.permute.xlu0 %748  ;;  %v759_v8 = vpop.permute.xlu1 %758 }
  0xaa   : > { %v751_v9 = vunpack.i.h.bf16 %v749_v7  ;;  %v750_v10 = vunpack.i.l.bf16 %v749_v7  ;;  %v761_v15 = vunpack.i.h.bf16 %v759_v8  ;;  %v760_v16 = vunpack.i.l.bf16 %v759_v8 }
  0xac   : > { %v298_v11 = vsel %vm297_vm0, %v750_v10, %v751_v9  ;;  %v299_v12 = vsel %vm297_vm0, %v751_v9, %v750_v10  ;;  %v291_v28 = vsel %vm290_vm2, %v760_v16, %v761_v15  ;;  %v292_v29 = vsel %vm290_vm2, %v761_v15, %v760_v16 }
  0xad   : > { %v308_v13 = vpack.c.bf16 %v298_v11, %v298_v11  ;;  %v309_v14 = vpack.c.bf16 %v299_v12, %v299_v12 }
  0xaf   : > { %v323_v17 = vsel %vm321_vm1, %v308_v13, 0  ;;  %v326_v18 = vsel %vm321_vm1, %v309_v14, 0 }
  0xb0   : > { %331 = vmatpush.bf16.msra.mxu0 %v323_v17  ;;  %345 = vmatpush.bf16.msra.mxu1 %v326_v18 }
  0xb1   : > { %v754_v20 = vpop.permute.xlu0 %753  ;;  %v764_v21 = vpop.permute.xlu1 %763 }
  0xb2   : > { %v756_v23 = vunpack.i.h.bf16 %v754_v20  ;;  %v755_v24 = vunpack.i.l.bf16 %v754_v20  ;;  %v766_v25 = vunpack.i.h.bf16 %v764_v21  ;;  %v765_v26 = vunpack.i.l.bf16 %v764_v21 }
  0xb4   : > { %v284_v30 = vsel %vm283_vm3, %v755_v24, %v756_v23  ;;  %v285_v31 = vsel %vm283_vm3, %v756_v23, %v755_v24  ;;  %v277_v32 = vsel %vm276_vm4, %v765_v26, %v766_v25  ;;  %v278_v33 = vsel %vm276_vm4, %v766_v25, %v765_v26 }
  0xb5   : > { %v306_v36 = vpack.c.bf16 %v291_v28, %v284_v30  ;;  %v307_v37 = vpack.c.bf16 %v292_v29, %v285_v31  ;;  %v304_v38 = vpack.c.bf16 %v277_v32, %v240_v1  ;;  %v305_v39 = vpack.c.bf16 %v278_v33, %v241_v2 }
  0xb7   : > { %332 = vmatpush.bf16.msra.mxu0 %v306_v36  ;;  %346 = vmatpush.bf16.msra.mxu1 %v307_v37 }
  0xb9   : > { %v784_v42 = vpop.permute.xlu1 %783  ;;  %v779_v43 = vpop.permute.xlu0 %778 }
  0xba   : > { %v786_v46 = vunpack.i.h.bf16 %v784_v42  ;;  %v785_v47 = vunpack.i.l.bf16 %v784_v42  ;;  %v781_v48 = vunpack.i.h.bf16 %v779_v43  ;;  %v780_v49 = vunpack.i.l.bf16 %v779_v43 }
  0xbb   : > { %333 = vmatpush.bf16.msra.mxu0 %v304_v38  ;;  %347 = vmatpush.bf16.msra.mxu1 %v305_v39 }
  0xbc   : > { %v250_v50 = vsel %vm248_vm7, %v781_v48, %v780_v49  ;;  %v257_v51 = vsel %vm255_vm8, %v786_v46, %v785_v47  ;;  %v249_v52 = vsel %vm248_vm7, %v780_v49, %v781_v48  ;;  %v256_v53 = vsel %vm255_vm8, %v785_v47, %v786_v46 }
  0xbd   : > { %v300_v56 = vpack.c.bf16 %v257_v51, %v250_v50  ;;  %v301_v57 = vpack.c.bf16 %v256_v53, %v249_v52 }
  0xbf   : > { %334 = vmatpush.bf16.msra.mxu0 %v302_v54  ;;  %348 = vmatpush.bf16.msra.mxu1 %v303_v55 }
  0xc3   : > { %335 = vmatpush.bf16.msra.mxu0 %v300_v56  ;;  %349 = vmatpush.bf16.msra.mxu1 %v301_v57 }
  0xc6   : > { %627 = vmatmul.msk.bf16.vlgmr.msra.gmra.mxu0 %vm317_vm9, %v637_v58  ;;  %628 = vmatmul.msk.bf16.vlgmr.msra.gmra.mxu1 %vm317_vm9, %v637_v58 }
 0x143   : > { %v1177_v59 = vpop.f32.mrf.mxu0  ;;  %v1179_v60 = vpop.f32.mrf.mxu1 }
 0x144   : > { %v1182_v61 = vmul.f32 0.70710677, %v1177_v59  ;;  %v1185_v62 = vmul.f32 0.70710677, %v1179_v60  ;;  %v356_v58 = vmul.f32 0.5, %v1177_v59 }
 0x146   : > { %v360_v63 = vand.u32 2147483647, %v1182_v61  ;;  %v361_v0 = vand.u32 2147483647, %v1185_v62  ;;  %vm426_vm3 = vcmp.ge.f32.partialorder %v1182_v61, 0.0  ;;  %vm427_vm4 = vcmp.ge.f32.partialorder %v1185_v62, 0.0 }
 0x148   : > { %v362_v1 = vmul.f32 0.3275911, %v360_v63  ;;  %v363_v2 = vmul.f32 0.3275911, %v361_v0  ;;  %v414_v22 = vsub.f32 0.0, %v360_v63  ;;  %v415_v25 = vsub.f32 0.0, %v361_v0 }
 0x14a   : > { %v364_v3 = vadd.f32 1.0, %v362_v1  ;;  %v365_v4 = vadd.f32 1.0, %v363_v2  ;;  %v416_v30 = vmul.f32 %v414_v22, %v360_v63  ;;  %v417_v32 = vmul.f32 %v415_v25, %v361_v0 }
 0x14b   : > { %v357_v1 = vmul.f32 0.5, %v1179_v60 }
 0x14c   : > { %787 = vrcp.f32 %v364_v3  ;;  %v377_v10 = vand.u32 2147483648, %v364_v3  ;;  %v392_v13 = vand.u32 2147483648, %v365_v4  ;;  %v375_v14 = vand.u32 2147483647, %v364_v3 }
 0x14d   : > { %789 = vrcp.f32 %v365_v4  ;;  %v390_v16 = vand.u32 2147483647, %v365_v4  ;;  %vm371_vm12 = vweird.f32 %v364_v3  ;;  %vm386_vm14 = vweird.f32 %v365_v4 }
 0x14e   : > { %v378_v18 = vor.u32 1.1754944e-38, %v377_v10  ;;  %v393_v20 = vor.u32 1.1754944e-38, %v392_v13  ;;  %vm376_vm0 = vcmp.eq.f32.partialorder %v375_v14, 8.507059e+37  ;;  %v418_v36 = vmul.f32 1.442695, %v416_v30 }
 0x14f   : > { %vm391_vm2 = vcmp.eq.f32.partialorder %v390_v16, 8.507059e+37  ;;  %v420_v38 = vmul.f32 1.442695, %v417_v32  ;;  %v440_v10 = vld [vmem:[#allocation7] sm:$0x3] }
 0x150   : > { %791 = vpow2.f32 %v418_v36 }
 0x151   : > { %793 = vpow2.f32 %v420_v38 }
 0x152   : > { %v788_v5 = vpop.eup %787 }
 0x153   : > { %v790_v6 = vpop.eup %789  ;;  %v367_v7 = vmul.f32 %v788_v5, %v364_v3  ;;  %vm372_vm10 = vweird.f32 %v788_v5 }
 0x154   : > { %v382_v8 = vmul.f32 %v790_v6, %v365_v4  ;;  %vm387_vm11 = vweird.f32 %v790_v6  ;;  %vm373_vm13 = vmor %vm371_vm12, %vm372_vm10  ;;  %v339_v4 = vpop.f32.mrf.mxu0 }
 0x155   : > { %v368_v9 = vsub.f32 1.0, %v367_v7  ;;  %vm388_vm15 = vmor %vm386_vm14, %vm387_vm11  ;;  %v353_v7 = vpop.f32.mrf.mxu1 }
 0x156   : > { %v383_v11 = vsub.f32 1.0, %v382_v8  ;;  %v792_v48 = vpop.eup %791 }
 0x157   : > { %v369_v12 = vmul.f32 %v788_v5, %v368_v9  ;;  %v794_v50 = vpop.eup %793 }
 0x158   : > { %v384_v15 = vmul.f32 %v790_v6, %v383_v11 }
 0x159   : > { %v370_v17 = vadd.f32 %v788_v5, %v369_v12 }
 0x15a   : > { %v385_v19 = vadd.f32 %v790_v6, %v384_v15 }
 0x15b   : > { %v374_v21 = vsel %vm373_vm13, %v788_v5, %v370_v17 }
 0x15c   : > { %v379_v23 = vsel %vm376_vm0, %v378_v18, %v374_v21  ;;  %v389_v24 = vsel %vm388_vm15, %v790_v6, %v385_v19 }
 0x15d   : > { %v396_v26 = vmul.f32 1.0614054, %v379_v23  ;;  %v394_v27 = vsel %vm391_vm2, %v393_v20, %v389_v24 }
 0x15e   : > { %v397_v28 = vmul.f32 1.0614054, %v394_v27 }
 0x15f   : > { %v398_v29 = vadd.f32 -1.4531521, %v396_v26 }
 0x160   : > { %v399_v31 = vadd.f32 -1.4531521, %v397_v28 }
 0x161   : > { %v400_v33 = vmul.f32 %v398_v29, %v379_v23 }
 0x162   : > { %v401_v34 = vmul.f32 %v399_v31, %v394_v27 }
 0x163   : > { %v402_v35 = vadd.f32 1.4214138, %v400_v33 }
 0x164   : > { %v403_v37 = vadd.f32 1.4214138, %v401_v34 }
 0x165   : > { %v404_v39 = vmul.f32 %v402_v35, %v379_v23 }
 0x166   : > { %v405_v40 = vmul.f32 %v403_v37, %v394_v27 }
 0x167   : > { %v406_v41 = vadd.f32 -0.28449672, %v404_v39 }
 0x168   : > { %v407_v42 = vadd.f32 -0.28449672, %v405_v40 }
 0x169   : > { %v408_v43 = vmul.f32 %v406_v41, %v379_v23 }
 0x16a   : > { %v409_v44 = vmul.f32 %v407_v42, %v394_v27 }
 0x16b   : > { %v410_v45 = vadd.f32 0.2548296, %v408_v43 }
 0x16c   : > { %v411_v46 = vadd.f32 0.2548296, %v409_v44 }
 0x16d   : > { %v412_v47 = vmul.f32 %v410_v45, %v379_v23 }
 0x16e   : > { %v413_v49 = vmul.f32 %v411_v46, %v394_v27 }
 0x16f   : > { %v422_v51 = vmul.f32 %v792_v48, %v412_v47 }
 0x170   : > { %v423_v52 = vmul.f32 %v794_v50, %v413_v49 }
 0x171   : > { %v424_v53 = vsub.f32 1.0, %v422_v51 }
 0x172   : > { %v425_v54 = vsub.f32 1.0, %v423_v52 }
 0x173   : > { %v428_v55 = vsub.f32 0.0, %v424_v53 }
 0x174   : > { %v429_v56 = vsub.f32 0.0, %v425_v54 }
 0x175   : > { %v430_v57 = vsel %vm426_vm3, %v424_v53, %v428_v55 }
 0x176   : > { %v432_v63 = vadd.f32 1.0, %v430_v57  ;;  %v431_v0 = vsel %vm427_vm4, %v425_v54, %v429_v56 }
 0x177   : > { %v433_v2 = vadd.f32 1.0, %v431_v0 }
 0x178   : > { %v434_v3 = vmul.f32 %v432_v63, %v356_v58 }
 0x179   : > { %v435_v5 = vmul.f32 %v433_v2, %v357_v1 }
 0x17a   : > { %v436_v6 = vmul.f32 %v434_v3, %v339_v4 }
 0x17b   : > { %v437_v8 = vmul.f32 %v435_v5, %v353_v7 }
 0x17c   : > { %v438_v61 = vpack.c.bf16 %v436_v6, %v436_v6 }
 0x17d   : > { %v439_v9 = vpack.c.bf16 %v437_v8, %v437_v8 }
 0x17e   : > { %v446_v62 = vsel %vm321_vm1, %v438_v61, 0 }
 0x17f   : > { %458 = vmatpush.bf16.msra.mxu2 %v446_v62  ;;  %v449_v59 = vsel %vm321_vm1, %v439_v9, 0 }
 0x180   : > { %471 = vmatpush.bf16.msra.mxu3 %v449_v59 }
 0x182   : > { %629 = vmatmul.msk.bf16.vlgmr.msra.gmra.mxu2 %vm441_vm5, %v440_v10 }
 0x183   : > { %630 = vmatmul.msk.bf16.vlgmr.msra.gmra.mxu3 %vm441_vm5, %v440_v10 }
 0x205   : > { %v460_v60 = vpop.f32.mrf.mxu2 }
 0x206   : > { %v473_v11 = vpop.f32.mrf.mxu3 }
 0x207   : > { %v479_v12 = vrot.slane %v473_v11, 4 }
 0x209   : > { %v480_v13 = vsel %vm321_vm1, %v460_v60, %v479_v12 }
 0x20a   : > { %482 = vst [vmem:[%s237_s10] sm:$0xff] %v480_v13 }
 0x20b   : > { %912 = shalt.err (!%p909_p12)
}
 0x20c   : > { %648 = dma.vmem_to_hbm [thread:$0]  (%p1112_p0), %s500_s2, 128, %s502_s25, %s484_s15  }
 0x20d   : > { %v462_v14 = vpop.f32.mrf.mxu2 }
 0x20e   : > { %v475_v15 = vpop.f32.mrf.mxu3 }
 0x20f PF: > { %p670_p13 = scmp.ge.s32.totalorder %s987_s19, 2  ;;  %s513_s11 = sand.u32 1, %s959_s12  }
 0x210   : > { %s514_s5 = scalar_lea.sflag [#allocation4], %s513_s11 }
 0x211   : > { %p662_p2 = pnand %p670_p13, %p1119_p6 }
 0x213   : > { %p663_p4 = pneg %p662_p2 }
 0x215   : > { %954 = dma.done.wait (%p663_p4), %s514_s5, 128  }
 0x216   : > { %956 = vsyncadd (%p663_p4), %s514_s5, 4294967168  ;;  %s20_s19 = sadd.s32 1, %s987_s19   ;;  %s1260_s26 = sld [smem:[#allocation12_spill]] }
 0x217   : > { %p17_p5 = scmp.ge.s32.totalorder %s20_s19, 6   ;;  %s1261_s6 = sld [smem:[#allocation13_spill]] }
 0x218   : > { %s1262_s12 = smov %s963_s13  ;;  %s1263_s13 = smov %s967_s14 }
 0x219   : > { %s1264_s14 = smov %s1126_s4  ;;  %s1265_s15 = smov %s979_s17 }
 0x21a   : > { %s1266_s16 = smov %s983_s18  ;;  %19 = sbr.rel (!%p17_p5) target bundleno = 11 (0xb), region = 85 }
 0x21c   : > { %s1267_s17 = smov %s1260_s26 }
 0x21d   : > { %s1268_s18 = smov %s1261_s6 }
 0x21f   :  { %520 = vsyncpa [#allocation3], 1 }
 0x220   :  { %522 = vsyncpa [#allocation3 + $0x1], 1 }
 0x221   :  { %523 = vsyncpa [#allocation6], 1 }
 0x222   :  { %524 = vsyncpa [#allocation4], 1 }
 0x223   :  { %526 = vsyncpa [#allocation4 + $0x1], 1 }

</bundles_post_ra>
